<compile_context>
chip_gen: v5e
topology: v5e:2x2
jax: 0.10.0
libtpu: 0.0.40
codegen_flags: <defaults>
</compile_context>

<pallas_src>
import jax
import jax.numpy as jnp
from jax import lax
from jax.experimental import pallas as pl
from jax.experimental.pallas import tpu as pltpu

C_IN, C_OUT, KSIZE, PAD = 4, 8, 3, 1
K_RAW = KSIZE ** 3 * C_IN            # 108 taps * channels
K_PAD = 112                          # 108 + 1 bias row + 3 zero rows (multiple of 8 sublanes)
TN_MAX = 8192                        # lane-dense N tile cap; 112*8192*4*2 ≈ 7.3 MiB double-buffered
CAST_BF16 = False                    # optional HBM-traffic halving (may exceed 1e-4 tolerance)


# ----------------------------- Pallas kernel --------------------------------
def _equiv_conv_kernel(w_ref, p_ref, o_ref):
    # w_ref: (C_OUT, K_PAD)   p_ref: (K_PAD, TN)   o_ref: (C_OUT, TN)
    o_ref[...] = jnp.dot(w_ref[...], p_ref[...],
                         preferred_element_type=jnp.float32).astype(o_ref.dtype)


# ------------------------------ glue (JAX) -----------------------------------
def build_weight(w, b):
    """(C_out,C_in,3,3,3), (C_out,) -> (C_out, K_PAD) pre-averaged, bias folded.

    Valid because conv is linear in w and each Equivariantize branch equals a
    conv with a spatially flipped kernel (stride 1, symmetric 'same' padding).
    """
    wavg = 0.25 * (w
                   + jnp.flip(w, (2, 3))     # input flip dims (2, 3) -> D, H
                   + jnp.flip(w, (3, 4))     # input flip dims (3, 4) -> H, W
                   + jnp.flip(w, (2, 4)))    # input flip dims (2, 4) -> D, W
    rows = jnp.transpose(wavg, (0, 2, 3, 4, 1)).reshape(C_OUT, K_RAW)   # (8, 108)
    bias_col = b.reshape(C_OUT, 1)                                      # bias as column 108
    zpad = jnp.zeros((C_OUT, K_PAD - K_RAW - 1), rows.dtype)
    return jnp.concatenate([rows, bias_col, zpad], axis=1)              # (8, 112)


def _im2col_3d(x):
    """(B, C, D, H, W) -> (B, 108, D*H*W), offset-major / channel-minor."""
    # TODO(synk): for larger volumes, fuse im2col into the Pallas kernel
    # (halo-padded x tile in VMEM, 27 shifted taps accumulated in-kernel) to
    # avoid the ~28x patches HBM materialization.
    B, C, D, H, W = x.shape
    xp = jnp.pad(x, ((0, 0), (0, 0), (PAD, PAD), (PAD, PAD), (PAD, PAD)))
    cols = []
    for dz in range(KSIZE):
        for dy in range(KSIZE):
            for dx in range(KSIZE):
                cols.append(xp[:, :, dz:dz + D, dy:dy + H, dx:dx + W])
    return jnp.stack(cols, axis=1).reshape(B, K_RAW, D * H * W)


def _choose_tiling(nv, tn_max=TN_MAX):
    """Pick TN (multiple of 128, <= tn_max) and the zero-pad needed on Nv."""
    candidates = []
    if nv % 128 == 0:
        candidates.append(nv)                      # prefer no padding at all
    candidates.append(((nv + 127) // 128) * 128)   # fall back: pad to lane multiple
    for padded in candidates:
        best = 0
        t = 128
        while t <= min(padded, tn_max):
            if padded % t == 0:
                best = t
            t += 128
        if best:
            return best, padded - nv
    raise AssertionError("unreachable: padded Nv is always a multiple of 128")


def equivariantize_forward(a, wk):
    """Exact port of Equivariantize.forward with net = Conv3d above."""
    B, C, D, H, W = a.shape
    assert C == C_IN, C
    nv = D * H * W

    patches = _im2col_3d(a)                                       # (B, 108, Nv)
    ones = jnp.ones((B, 1, nv), patches.dtype)                    # bias row (col 108 of wk)
    zpad = jnp.zeros((B, K_PAD - K_RAW - 1, nv), patches.dtype)
    patches = jnp.concatenate([patches, ones, zpad], axis=1)      # (B, 112, Nv)

    tn, n_rem = _choose_tiling(nv)
    if n_rem:
        # TODO(synk): handle the ragged tail with an in-kernel masked store
        # instead of re-materializing the patches array with zero columns.
        patches = jnp.pad(patches, ((0, 0), (0, 0), (0, n_rem)))
    nv_pad = nv + n_rem
    nt = nv_pad // tn

    if CAST_BF16:
        patches = patches.astype(jnp.bfloat16)
        wk = wk.astype(jnp.bfloat16)

    out = pl.pallas_call(
        _equiv_conv_kernel,
        out_shape=jax.ShapeDtypeStruct((B, C_OUT, nv_pad), jnp.float32),
        grid=(B, nt),
        in_specs=[
            pl.BlockSpec((C_OUT, K_PAD), lambda b, n: (0, 0)),
            pl.BlockSpec((None, K_PAD, tn), lambda b, n: (b, 0, n)),
        ],
        out_specs=pl.BlockSpec((None, C_OUT, tn), lambda b, n: (b, 0, n)),
        compiler_params=pltpu.CompilerParams(
            dimension_semantics=("parallel", "parallel"),
            vmem_limit_bytes=32 * 1024 * 1024),
    )(wk, patches)

    if n_rem:
        out = out[:, :, :nv]
    return out.reshape(B, C_OUT, D, H, W)


# --------------------------- pure-JAX reference -------------------------------
def _conv3d_ref(x, w, b):
    y = lax.conv_general_dilated(
        x, w, window_strides=(1, 1, 1), padding=((PAD, PAD),) * 3,
        dimension_numbers=("NCDHW", "OIDHW", "NCDHW"))
    return y + b.reshape(1, -1, 1, 1, 1)


def equivariantize_ref(a, w, b):
    net = lambda x: _conv3d_ref(x, w, b)
    i = net(a)
    i = i + jnp.flip(net(jnp.flip(a, (2, 3))), (2, 3))
    i = i + jnp.flip(net(jnp.flip(a, (3, 4))), (3, 4))
    i = i + jnp.flip(net(jnp.flip(a, (2, 4))), (2, 4))
    return i / 4


# ---------------------------------- main --------------------------------------
if __name__ == "__main__":
    key = jax.random.PRNGKey(0)
    kw, kb, kx = jax.random.split(key, 3)

    B, D, H, W = 2, 4, 8, 8
    w = jax.random.normal(kw, (C_OUT, C_IN, KSIZE, KSIZE, KSIZE), jnp.float32) * 0.1
    b = jax.random.normal(kb, (C_OUT,), jnp.float32) * 0.01
    a = jax.random.normal(kx, (B, C_IN, D, H, W), jnp.float32)

    wk = build_weight(w, b)                       # (8, 112) pre-averaged, bias folded

    fwd = jax.jit(equivariantize_forward)
    out = fwd(a, wk)
    jax.block_until_ready(out)

    ref = equivariantize_ref(a, w, b)
    assert out.shape == (B, C_OUT, D, H, W), out.shape
    max_err = float(jnp.max(jnp.abs(out - ref)))
    assert jnp.allclose(out, ref, rtol=1e-4, atol=1e-4), max_err
    print("KERNEL_OK")
</pallas_src>

<mosaic_0001>
module attributes {stable_mosaic.version = 11 : i64} {
  func.func @_equiv_conv_kernel(%arg0: i32, %arg1: i32, %arg2: memref<8x112xf32, #tpu.memory_space<vmem>>, %arg3: memref<1x112x256xf32, #tpu.memory_space<vmem>>, %arg4: memref<1x8x256xf32, #tpu.memory_space<vmem>>) attributes {dimension_semantics = [#tpu.dimension_semantics<parallel>, #tpu.dimension_semantics<parallel>], iteration_bounds = array<i64: 2, 1>, scalar_prefetch = 0 : i64, scratch_operands = 0 : i64, tpu.core_type = #tpu.core_type<tc>, window_params = [{pipeline_mode = #tpu.pipeline_mode<synchronous>, transform_indices = @transform_0, window_bounds = array<i64: 8, 112>}, {transform_indices = @transform_1, window_bounds = array<i64: 1, 112, 256>}, {transform_indices = @transform_2, window_bounds = array<i64: 1, 8, 256>}]} {
    %c0 = arith.constant 0 : index
    %c0_0 = arith.constant 0 : index
    %0 = vector.load %arg2[%c0, %c0_0] : memref<8x112xf32, #tpu.memory_space<vmem>>, vector<8x112xf32>
    %c0_1 = arith.constant 0 : index
    %c0_2 = arith.constant 0 : index
    %c0_3 = arith.constant 0 : index
    %1 = vector.load %arg3[%c0_1, %c0_2, %c0_3] : memref<1x112x256xf32, #tpu.memory_space<vmem>>, vector<1x112x256xf32>
    %2 = vector.shape_cast %1 : vector<1x112x256xf32> to vector<112x256xf32>
    %cst = arith.constant dense<0.000000e+00> : vector<8x256xf32>
    %3 = tpu.matmul %0, %2, %cst {dimension_numbers = #tpu.dot_dimension_numbers<[1], [0], [0], [1], [0, 0, 1, 1], [], []>} : vector<8x112xf32>, vector<112x256xf32>, vector<8x256xf32> -> vector<8x256xf32>
    %c0_4 = arith.constant 0 : index
    %c0_5 = arith.constant 0 : index
    %c0_6 = arith.constant 0 : index
    %4 = vector.load %arg4[%c0_4, %c0_5, %c0_6] : memref<1x8x256xf32, #tpu.memory_space<vmem>>, vector<1x8x256xf32>
    %5 = vector.shape_cast %4 : vector<1x8x256xf32> to vector<8x256xf32>
    %6 = vector.shape_cast %3 : vector<8x256xf32> to vector<1x8x256xf32>
    tpu.vector_store %arg4[%c0_4, %c0_5, %c0_6], %6 {strides = array<i32>} : memref<1x8x256xf32, #tpu.memory_space<vmem>>, vector<1x8x256xf32>,
    return
  }
  func.func @transform_0(%arg0: i32, %arg1: i32) -> (i32, i32) {
    %c0_i32 = arith.constant 0 : i32
    %c0_i32_0 = arith.constant 0 : i32
    %c0_i32_1 = arith.constant 0 : i32
    return %c0_i32, %c0_i32_0 : i32, i32
  }
  func.func @transform_1(%arg0: i32, %arg1: i32) -> (i32, i32, i32) {
    %c0_i32 = arith.constant 0 : i32
    %c0_i32_0 = arith.constant 0 : i32
    return %arg0, %c0_i32, %arg1 : i32, i32, i32
  }
  func.func @transform_2(%arg0: i32, %arg1: i32) -> (i32, i32, i32) {
    %c0_i32 = arith.constant 0 : i32
    %c0_i32_0 = arith.constant 0 : i32
    return %arg0, %c0_i32, %arg1 : i32, i32, i32
  }
}

</mosaic_0001>

<bundles_post_ra>
// kernel: equivariantize_forward.1
= control target key start
LH: loop header
LB: loop body
LE: loop exit
PB: predicated region body
PF: predicated region fallthrough
CT: control target
= control target key end

     0   :  { %s422_s9 = smov 0   ;;  %s424_s10 = smov 0   ;;  %s492_s0 = inlined_call_operand.vmem [shape: f32[8,112], index: 0, kind: input, shape index: {}]   ;;  %s493_s1 = inlined_call_operand.vmem [shape: f32[2,112,256], index: 1, kind: input, shape index: {}]   ;;  %s494_s2 = inlined_call_operand.vmem [shape: f32[2,8,256], index: 2, kind: output, shape index: {}]  }
   0x1   :  { %s426_s11 = smov 0  }
   0x2 LB: > { %s24_s12 = sadd.s32 1, %s401_s10  ;;  %p349_p0 = scmp.ge.s32.totalorder %s405_s11, 1  ;;  %s405_s11 = sphi %s426_s11, %s12_s11   ;;  %s401_s10 = sphi %s424_s10, %s496_s10   ;;  %s397_s9 = sphi %s422_s9, %s495_s9  }
   0x3   : > { %p26_p1 = scmp.ge.s32.totalorder %s24_s12, 2  ;;  %p133_p2 = scmp.lt.s32.totalorder %s405_s11, 3 }
   0x5   : > { %s498_s12 = smov (%p26_p1, %s24_s12), 0  ;;  %p134_p3 = pnand %p349_p0, %p133_p2 }
   0x6   : > { %p164_p4 = scmp.lt.s32.totalorder (!%p134_p3), %s397_s9, 1 }
   0x7   : > { %137 = sbr.rel (%p134_p3) target bundleno = 172 (0xac), region = 28 }
   0xc   : > { %s500_s9 = smov (!%p164_p4, %s397_s9), 1  ;;  %v183_v28 = vld [vmem:[%s492_s0] sm:$0xff]  ;;  %vm212_vm0 = vcmask 916480  }
   0xd   : > { %s358_s13 = smul.u32 224, %s500_s9  ;;  %s357_s19 = sshll.u32 %s500_s9, 4 }
   0xe   : > { %s181_s22 = scalar_lea.vmem %s494_s2, %s357_s19 }
   0xf   : > { %s446_s16 = scalar_lea.vmem %s493_s1, %s358_s13 }
  0x10   : > { %v210_v0 = vld [vmem:[%s446_s16 + $0xd0] sm:$0xff]  ;;  %v211_v1 = vld [vmem:[%s446_s16 + $0xd8] sm:$0xff]  ;;  %v208_v2 = vld [vmem:[%s446_s16 + $0xc0] sm:$0xff] }
  0x11   : > { %218 = vmatpush.msra.mxu0 %v210_v0  ;;  %238 = vmatpush.msra.mxu1 %v211_v1  ;;  %v209_v3 = vld [vmem:[%s446_s16 + $0xc8] sm:$0xff]  ;;  %v206_v4 = vld [vmem:[%s446_s16 + $0xb0] sm:$0xff]  ;;  %v207_v5 = vld [vmem:[%s446_s16 + $0xb8] sm:$0xff] }
  0x12   : > { %v204_v6 = vld [vmem:[%s446_s16 + $0xa0] sm:$0xff]  ;;  %v205_v7 = vld [vmem:[%s446_s16 + $0xa8] sm:$0xff]  ;;  %v202_v8 = vld [vmem:[%s446_s16 + $0x90] sm:$0xff] }
  0x13   : > { %219 = vmatpush.msra.mxu0 %v208_v2  ;;  %239 = vmatpush.msra.mxu1 %v209_v3  ;;  %v203_v9 = vld [vmem:[%s446_s16 + $0x98] sm:$0xff]  ;;  %v200_v10 = vld [vmem:[%s446_s16 + $0x80] sm:$0xff]  ;;  %v201_v11 = vld [vmem:[%s446_s16 + $0x88] sm:$0xff] }
  0x14   : > { %v198_v12 = vld [vmem:[%s446_s16 + $0x70] sm:$0xff]  ;;  %v199_v13 = vld [vmem:[%s446_s16 + $0x78] sm:$0xff]  ;;  %v196_v14 = vld [vmem:[%s446_s16 + $0x60] sm:$0xff] }
  0x15   : > { %220 = vmatpush.msra.mxu0 %v206_v4  ;;  %240 = vmatpush.msra.mxu1 %v207_v5  ;;  %v197_v15 = vld [vmem:[%s446_s16 + $0x68] sm:$0xff]  ;;  %v194_v16 = vld [vmem:[%s446_s16 + $0x50] sm:$0xff]  ;;  %v195_v17 = vld [vmem:[%s446_s16 + $0x58] sm:$0xff] }
  0x16   : > { %v192_v18 = vld [vmem:[%s446_s16 + $0x40] sm:$0xff]  ;;  %v193_v19 = vld [vmem:[%s446_s16 + $0x48] sm:$0xff]  ;;  %v190_v20 = vld [vmem:[%s446_s16 + $0x30] sm:$0xff] }
  0x17   : > { %221 = vmatpush.msra.mxu0 %v204_v6  ;;  %241 = vmatpush.msra.mxu1 %v205_v7  ;;  %v191_v21 = vld [vmem:[%s446_s16 + $0x38] sm:$0xff]  ;;  %v188_v22 = vld [vmem:[%s446_s16 + $0x20] sm:$0xff]  ;;  %v189_v23 = vld [vmem:[%s446_s16 + $0x28] sm:$0xff] }
  0x18   : > { %v186_v24 = vld [vmem:[%s446_s16 + $0x10] sm:$0xff]  ;;  %v187_v25 = vld [vmem:[%s446_s16 + $0x18] sm:$0xff]  ;;  %v184_v26 = vld [vmem:[%s446_s16] sm:$0xff] }
  0x19   : > { %222 = vmatpush.msra.mxu0 %v202_v8  ;;  %242 = vmatpush.msra.mxu1 %v203_v9  ;;  %v185_v27 = vld [vmem:[%s446_s16 + $0x8] sm:$0xff] }
  0x1b   : > { %223 = vmatpush.msra.mxu0 %v200_v10  ;;  %243 = vmatpush.msra.mxu1 %v201_v11 }
  0x1d   : > { %224 = vmatpush.msra.mxu0 %v198_v12  ;;  %244 = vmatpush.msra.mxu1 %v199_v13 }
  0x1f   : > { %225 = vmatpush.msra.mxu0 %v196_v14  ;;  %245 = vmatpush.msra.mxu1 %v197_v15 }
  0x21   : > { %226 = vmatpush.msra.mxu0 %v194_v16  ;;  %246 = vmatpush.msra.mxu1 %v195_v17 }
  0x23   : > { %227 = vmatpush.msra.mxu0 %v192_v18  ;;  %247 = vmatpush.msra.mxu1 %v193_v19 }
  0x25   : > { %228 = vmatpush.msra.mxu0 %v190_v20  ;;  %248 = vmatpush.msra.mxu1 %v191_v21 }
  0x27   : > { %229 = vmatpush.msra.mxu0 %v188_v22  ;;  %249 = vmatpush.msra.mxu1 %v189_v23 }
  0x29   : > { %230 = vmatpush.msra.mxu0 %v186_v24  ;;  %250 = vmatpush.msra.mxu1 %v187_v25 }
  0x2b   : > { %231 = vmatpush.msra.mxu0 %v184_v26  ;;  %251 = vmatpush.msra.mxu1 %v185_v27 }
  0x2c   : > { %353 = vmatmul.msk.f32.vlgmr.msra.gmra.mxu0 %vm212_vm0, %v183_v28  ;;  %354 = vmatmul.msk.f32.vlgmr.msra.gmra.mxu1 %vm212_vm0, %v183_v28 }
  0xa9   : > { %v233_v29 = vpop.f32.mrf.mxu0  ;;  %v253_v30 = vpop.f32.mrf.mxu1 }
  0xaa   : > { %256 = vst [vmem:[%s181_s22] sm:$0xff] %v233_v29 }
  0xab   : > { %257 = vst [vmem:[%s181_s22 + $0x8] sm:$0xff] %v253_v30 }
  0xac PF: > { %s12_s11 = sadd.s32 1, %s405_s11   ;;  %s495_s9 = smov %s401_s10 }
  0xad   : > { %p9_p5 = scmp.ge.s32.totalorder %s12_s11, 4   ;;  %s496_s10 = smov %s498_s12 }
  0xaf   :  { %11 = sbr.rel (!%p9_p5) target bundleno = 2 (0x2), region = 58 }

</bundles_post_ra>
